<compile_context>
chip_gen: v5e
topology: v5e:2x2
jax: 0.10.0
libtpu: 0.0.40
codegen_flags: <defaults>
</compile_context>

<pallas_src>
import functools

import jax
import jax.numpy as jnp
from jax.experimental import pallas as pl
from jax.experimental.pallas import tpu as pltpu


# ----------------------------------------------------------------------------
# Kernel: one batch tile of the 3-layer MLP, batch in the lane dimension.
# ----------------------------------------------------------------------------
def _ranker_mlp_kernel(min_out, max_out, apply_sigmoid,
                       x_ref,                      # (K,  Bt)  activation slab
                       w1_ref, b1_ref,             # (H1, K), (H1, 1)
                       w2_ref, b2_ref,             # (H2, H1), (H2, 1)
                       w3_ref, b3_ref,             # (1,  H2), (1, 1)
                       o_ref):                     # (1,  Bt)  lane-dense
    x = x_ref[...]

    # Layer 1: single fused (H1, K) x (K, Bt) MXU pass, f32 accumulation.
    h1 = jnp.dot(w1_ref[...], x, preferred_element_type=jnp.float32)
    h1 = jnp.maximum(h1 + b1_ref[...], 0.0)                          # (H1, Bt) f32

    # Layer 2.  astype keeps the MXU fed with the weight dtype (no-op for f32).
    h2 = jnp.dot(w2_ref[...], h1.astype(w2_ref.dtype),
                 preferred_element_type=jnp.float32)
    h2 = jnp.maximum(h2 + b2_ref[...], 0.0)                          # (H2, Bt) f32

    # Layer 3.
    logits = jnp.dot(w3_ref[...], h2.astype(w3_ref.dtype),
                     preferred_element_type=jnp.float32) + b3_ref[...]  # (1, Bt)

    if apply_sigmoid:
        out = jax.nn.sigmoid(logits) * (max_out - min_out) + min_out
    else:
        out = logits
    o_ref[...] = out.astype(o_ref.dtype)


def _pick_b_tile(batch, b_tile):
    """Lane-dense batch tile; keep >=2 tiles when the batch allows (v7x)."""
    b128 = pl.cdiv(batch, 128) * 128
    bt = min(b_tile, b128)
    if bt == b128 and bt >= 256:
        bt //= 2                      # at least 2 grid tiles -> both v7x cores
    bt = max(128, (bt // 128) * 128)  # multiple of 128 (lane dense)
    return bt


# ----------------------------------------------------------------------------
# Wrapper: XLA does the embedding gather; kernel does the pipelined MLP.
# ----------------------------------------------------------------------------
def ranker_nn_forward(user, item, genre, params,
                      max_output_value=5.0, min_output_value=1.0,
                      apply_sigmoid=True, b_tile=512,
                      matmul_dtype=jnp.float32):
    """user, item: (B,) int; genre: (B, num_genres) float. Returns (B,) f32."""
    B = user.shape[0]
    D = params["user_emb"].shape[1]
    G = genre.shape[1]
    K = 2 * D + G
    H1 = params["w1"].shape[0]
    H2 = params["w2"].shape[0]

    bt = _pick_b_tile(B, b_tile)
    b_pad = pl.cdiv(B, bt) * bt
    n_tiles = b_pad // bt

    # Embedding lookup + concat in XLA (tiny gather), then transpose so the
    # batch lives in the lane dimension: lane-dense (K, b_pad) activation slab.
    ue = params["user_emb"][user]                                     # (B, D)
    ie = params["item_emb"][item]                                     # (B, D)
    x = jnp.concatenate([ue, ie, genre.astype(jnp.float32)], axis=1)  # (B, K)
    x = jnp.pad(x, ((0, b_pad - B), (0, 0)))
    x_t = x.T.astype(matmul_dtype)                                    # (K, b_pad)

    # PyTorch (out, in) layout weights; biases as column vectors (f32 always).
    w1 = params["w1"].astype(matmul_dtype)                            # (H1, K)
    w2 = params["w2"].astype(matmul_dtype)                            # (H2, H1)
    w3 = params["w3"].astype(matmul_dtype)                            # (1,  H2)
    b1 = params["b1"].reshape(H1, 1).astype(jnp.float32)
    b2 = params["b2"].reshape(H2, 1).astype(jnp.float32)
    b3 = params["b3"].reshape(1, 1).astype(jnp.float32)

    resident = lambda i: (0, 0)        # weights/biases stay resident in VMEM

    grid_spec = pltpu.PrefetchScalarGridSpec(
        num_scalar_prefetch=0,
        grid=(n_tiles,),
        in_specs=[
            pl.BlockSpec((K, bt), lambda i: (0, i)),   # activation slab tile
            pl.BlockSpec((H1, K), resident),           # w1 (fused)
            pl.BlockSpec((H1, 1), resident),           # b1
            pl.BlockSpec((H2, H1), resident),          # w2
            pl.BlockSpec((H2, 1), resident),           # b2
            pl.BlockSpec((1, H2), resident),           # w3
            pl.BlockSpec((1, 1), resident),            # b3
        ],
        out_specs=pl.BlockSpec((1, bt), lambda i: (0, i)),
    )

    kernel = pl.pallas_call(
        functools.partial(_ranker_mlp_kernel,
                          float(min_output_value), float(max_output_value),
                          bool(apply_sigmoid)),
        out_shape=jax.ShapeDtypeStruct((1, b_pad), jnp.float32),
        grid_spec=grid_spec,
        compiler_params=pltpu.CompilerParams(
            dimension_semantics=("parallel",),         # batch tiles across TCs
        ),
    )
    out = kernel(x_t, w1, b1, w2, b2, w3, b3)
    # torch: .squeeze() then unsqueeze(0) if 0-dim  ->  always shape (B,)
    return out[0, :B]


# ----------------------------------------------------------------------------
# Parameter init (matches the PyTorch module) and a pure-JAX reference.
# ----------------------------------------------------------------------------
def init_params(key, num_users, num_items, embedding_dim=32, num_genres=1):
    ks = jax.random.split(key, 8)
    in1 = embedding_dim * 2 + num_genres

    def lin_init(kw, kb, fan_in, fan_out):
        bound = 1.0 / float(jnp.sqrt(fan_in))
        w = jax.random.uniform(kw, (fan_out, fan_in), jnp.float32, -bound, bound)
        b = jax.random.uniform(kb, (fan_out,), jnp.float32, -bound, bound)
        return w, b                                    # PyTorch (out, in) layout

    w1, b1 = lin_init(ks[2], ks[3], in1, 64)
    w2, b2 = lin_init(ks[4], ks[5], 64, 32)
    w3, b3 = lin_init(ks[6], ks[7], 32, 1)
    return {
        # nn.Embedding default init: N(0, 1)
        "user_emb": jax.random.normal(ks[0], (num_users + 1, embedding_dim), jnp.float32),
        "item_emb": jax.random.normal(ks[1], (num_items + 1, embedding_dim), jnp.float32),
        "w1": w1, "b1": b1, "w2": w2, "b2": b2, "w3": w3, "b3": b3,
    }


def reference_forward(user, item, genre, params, max_out=5.0, min_out=1.0):
    ue = params["user_emb"][user]
    ie = params["item_emb"][item]
    x = jnp.concatenate([ue, ie, genre], axis=1)
    h = jnp.maximum(x @ params["w1"].T + params["b1"], 0.0)
    h = jnp.maximum(h @ params["w2"].T + params["b2"], 0.0)
    o = h @ params["w3"].T + params["b3"]
    return (jax.nn.sigmoid(o) * (max_out - min_out) + min_out)[:, 0]


if __name__ == "__main__":
    num_users, num_items, embedding_dim, num_genres = 10, 20, 32, 1
    B = 8

    key = jax.random.PRNGKey(0)
    kp, ku, ki, kg = jax.random.split(key, 4)
    params = init_params(kp, num_users, num_items, embedding_dim, num_genres)

    user = jax.random.randint(ku, (B,), 0, num_users + 1, dtype=jnp.int32)
    item = jax.random.randint(ki, (B,), 0, num_items + 1, dtype=jnp.int32)
    genre = jax.random.uniform(kg, (B, num_genres), jnp.float32)

    # TODO(synk): pass matmul_dtype=jnp.bfloat16 on v5e/v6e/v7x production runs
    #             (keeps f32 accumulation & f32 elementwise; demo stays f32 to
    #             match the f32 reference at 1e-4).
    out = jax.block_until_ready(ranker_nn_forward(user, item, genre, params))
    ref = reference_forward(user, item, genre, params)

    assert out.shape == (B,), out.shape
    assert jnp.allclose(out, ref, atol=1e-4, rtol=1e-4), (out, ref)
    print("KERNEL_OK")
</pallas_src>

<mosaic_0001>
module attributes {stable_mosaic.version = 11 : i64} {
  func.func @_ranker_mlp_kernel(%arg0: i32, %arg1: memref<65x128xf32, #tpu.memory_space<vmem>>, %arg2: memref<64x65xf32, #tpu.memory_space<vmem>>, %arg3: memref<64x1xf32, #tpu.memory_space<vmem>>, %arg4: memref<32x64xf32, #tpu.memory_space<vmem>>, %arg5: memref<32x1xf32, #tpu.memory_space<vmem>>, %arg6: memref<1x32xf32, #tpu.memory_space<vmem>>, %arg7: memref<1x1xf32, #tpu.memory_space<vmem>>, %arg8: memref<1x128xf32, #tpu.memory_space<vmem>>) attributes {dimension_semantics = [#tpu.dimension_semantics<parallel>], iteration_bounds = array<i64: 1>, scalar_prefetch = 0 : i64, scratch_operands = 0 : i64, tpu.core_type = #tpu.core_type<tc>, window_params = [{transform_indices = @transform_0, window_bounds = array<i64: 65, 128>}, {pipeline_mode = #tpu.pipeline_mode<synchronous>, transform_indices = @transform_1, window_bounds = array<i64: 64, 65>}, {pipeline_mode = #tpu.pipeline_mode<synchronous>, transform_indices = @transform_2, window_bounds = array<i64: 64, 1>}, {pipeline_mode = #tpu.pipeline_mode<synchronous>, transform_indices = @transform_3, window_bounds = array<i64: 32, 64>}, {pipeline_mode = #tpu.pipeline_mode<synchronous>, transform_indices = @transform_4, window_bounds = array<i64: 32, 1>}, {pipeline_mode = #tpu.pipeline_mode<synchronous>, transform_indices = @transform_5, window_bounds = array<i64: 1, 32>}, {pipeline_mode = #tpu.pipeline_mode<synchronous>, transform_indices = @transform_6, window_bounds = array<i64: 1, 1>}, {transform_indices = @transform_7, window_bounds = array<i64: 1, 128>}]} {
    %c0 = arith.constant 0 : index
    %c0_0 = arith.constant 0 : index
    %0 = vector.load %arg1[%c0, %c0_0] : memref<65x128xf32, #tpu.memory_space<vmem>>, vector<65x128xf32>
    %c0_1 = arith.constant 0 : index
    %c0_2 = arith.constant 0 : index
    %1 = vector.load %arg2[%c0_1, %c0_2] : memref<64x65xf32, #tpu.memory_space<vmem>>, vector<64x65xf32>
    %cst = arith.constant dense<0.000000e+00> : vector<64x128xf32>
    %2 = tpu.matmul %1, %0, %cst {dimension_numbers = #tpu.dot_dimension_numbers<[1], [0], [0], [1], [0, 0, 1, 1], [], []>} : vector<64x65xf32>, vector<65x128xf32>, vector<64x128xf32> -> vector<64x128xf32>
    %c0_3 = arith.constant 0 : index
    %c0_4 = arith.constant 0 : index
    %3 = vector.load %arg3[%c0_3, %c0_4] : memref<64x1xf32, #tpu.memory_space<vmem>>, vector<64x1xf32>
    %4 = vector.broadcast %3 : vector<64x1xf32> to vector<64x128xf32>
    %5 = arith.addf %2, %4 : vector<64x128xf32>
    %cst_5 = arith.constant 0.000000e+00 : f32
    %6 = vector.broadcast %cst_5 : f32 to vector<64x128xf32>
    %7 = arith.maximumf %5, %6 : vector<64x128xf32>
    %c0_6 = arith.constant 0 : index
    %c0_7 = arith.constant 0 : index
    %8 = vector.load %arg4[%c0_6, %c0_7] : memref<32x64xf32, #tpu.memory_space<vmem>>, vector<32x64xf32>
    %cst_8 = arith.constant dense<0.000000e+00> : vector<32x128xf32>
    %9 = tpu.matmul %8, %7, %cst_8 {dimension_numbers = #tpu.dot_dimension_numbers<[1], [0], [0], [1], [0, 0, 1, 1], [], []>} : vector<32x64xf32>, vector<64x128xf32>, vector<32x128xf32> -> vector<32x128xf32>
    %c0_9 = arith.constant 0 : index
    %c0_10 = arith.constant 0 : index
    %10 = vector.load %arg5[%c0_9, %c0_10] : memref<32x1xf32, #tpu.memory_space<vmem>>, vector<32x1xf32>
    %11 = vector.broadcast %10 : vector<32x1xf32> to vector<32x128xf32>
    %12 = arith.addf %9, %11 : vector<32x128xf32>
    %cst_11 = arith.constant 0.000000e+00 : f32
    %13 = vector.broadcast %cst_11 : f32 to vector<32x128xf32>
    %14 = arith.maximumf %12, %13 : vector<32x128xf32>
    %c0_12 = arith.constant 0 : index
    %c0_13 = arith.constant 0 : index
    %15 = vector.load %arg6[%c0_12, %c0_13] : memref<1x32xf32, #tpu.memory_space<vmem>>, vector<1x32xf32>
    %cst_14 = arith.constant dense<0.000000e+00> : vector<1x128xf32>
    %16 = tpu.matmul %15, %14, %cst_14 {dimension_numbers = #tpu.dot_dimension_numbers<[1], [0], [0], [1], [0, 0, 1, 1], [], []>} : vector<1x32xf32>, vector<32x128xf32>, vector<1x128xf32> -> vector<1x128xf32>
    %c0_15 = arith.constant 0 : index
    %c0_16 = arith.constant 0 : index
    %17 = vector.load %arg7[%c0_15, %c0_16] : memref<1x1xf32, #tpu.memory_space<vmem>>, vector<1x1xf32>
    %18 = vector.broadcast %17 : vector<1x1xf32> to vector<1x128xf32>
    %19 = arith.addf %16, %18 : vector<1x128xf32>
    %20 = arith.negf %19 : vector<1x128xf32>
    %21 = math.exp %20 : vector<1x128xf32>
    %cst_17 = arith.constant 1.000000e+00 : f32
    %22 = vector.broadcast %cst_17 : f32 to vector<1x128xf32>
    %23 = arith.addf %22, %21 : vector<1x128xf32>
    %24 = arith.divf %22, %23 : vector<1x128xf32>
    %cst_18 = arith.constant 4.000000e+00 : f32
    %25 = vector.broadcast %cst_18 : f32 to vector<1x128xf32>
    %26 = arith.mulf %24, %25 : vector<1x128xf32>
    %cst_19 = arith.constant 1.000000e+00 : f32
    %27 = vector.broadcast %cst_19 : f32 to vector<1x128xf32>
    %28 = arith.addf %26, %27 : vector<1x128xf32>
    %c0_20 = arith.constant 0 : index
    %c0_21 = arith.constant 0 : index
    %29 = vector.load %arg8[%c0_20, %c0_21] : memref<1x128xf32, #tpu.memory_space<vmem>>, vector<1x128xf32>
    tpu.vector_store %arg8[%c0_20, %c0_21], %28 {strides = array<i32>} : memref<1x128xf32, #tpu.memory_space<vmem>>, vector<1x128xf32>,
    return
  }
  func.func @transform_0(%arg0: i32) -> (i32, i32) {
    %c0_i32 = arith.constant 0 : i32
    %c0_i32_0 = arith.constant 0 : i32
    return %c0_i32, %arg0 : i32, i32
  }
  func.func @transform_1(%arg0: i32) -> (i32, i32) {
    %c0_i32 = arith.constant 0 : i32
    %c0_i32_0 = arith.constant 0 : i32
    %c0_i32_1 = arith.constant 0 : i32
    return %c0_i32, %c0_i32_0 : i32, i32
  }
  func.func @transform_2(%arg0: i32) -> (i32, i32) {
    %c0_i32 = arith.constant 0 : i32
    %c0_i32_0 = arith.constant 0 : i32
    %c0_i32_1 = arith.constant 0 : i32
    return %c0_i32, %c0_i32_0 : i32, i32
  }
  func.func @transform_3(%arg0: i32) -> (i32, i32) {
    %c0_i32 = arith.constant 0 : i32
    %c0_i32_0 = arith.constant 0 : i32
    %c0_i32_1 = arith.constant 0 : i32
    return %c0_i32, %c0_i32_0 : i32, i32
  }
  func.func @transform_4(%arg0: i32) -> (i32, i32) {
    %c0_i32 = arith.constant 0 : i32
    %c0_i32_0 = arith.constant 0 : i32
    %c0_i32_1 = arith.constant 0 : i32
    return %c0_i32, %c0_i32_0 : i32, i32
  }
  func.func @transform_5(%arg0: i32) -> (i32, i32) {
    %c0_i32 = arith.constant 0 : i32
    %c0_i32_0 = arith.constant 0 : i32
    %c0_i32_1 = arith.constant 0 : i32
    return %c0_i32, %c0_i32_0 : i32, i32
  }
  func.func @transform_6(%arg0: i32) -> (i32, i32) {
    %c0_i32 = arith.constant 0 : i32
    %c0_i32_0 = arith.constant 0 : i32
    %c0_i32_1 = arith.constant 0 : i32
    return %c0_i32, %c0_i32_0 : i32, i32
  }
  func.func @transform_7(%arg0: i32) -> (i32, i32) {
    %c0_i32 = arith.constant 0 : i32
    %c0_i32_0 = arith.constant 0 : i32
    return %c0_i32, %arg0 : i32, i32
  }
}

</mosaic_0001>

<bundles_post_ra>
// kernel: tpu_custom_call.1
= control target key start
LH: loop header
LB: loop body
LE: loop exit
PB: predicated region body
PF: predicated region fallthrough
CT: control target
= control target key end

     0   :  { %s606_s0 = inlined_call_operand.vmem [shape: f32[65,128], index: 0, kind: input, shape index: {}]   ;;  %s607_s1 = inlined_call_operand.hbm [shape: f32[64,65], index: 1, kind: input, shape index: {}]   ;;  %s608_s2 = inlined_call_operand.vmem [shape: f32[64,1], index: 2, kind: input, shape index: {}]   ;;  %s609_s3 = inlined_call_operand.hbm [shape: f32[32,64], index: 3, kind: input, shape index: {}]   ;;  %s610_s4 = inlined_call_operand.vmem [shape: f32[32,1], index: 4, kind: input, shape index: {}]   ;;  %s611_s5 = inlined_call_operand.vmem [shape: f32[1,32], index: 5, kind: input, shape index: {}]   ;;  %s612_s6 = inlined_call_operand.<no memory space> [shape: f32[1,1], index: 6, kind: input, shape index: {}]   ;;  %s613_s7 = inlined_call_operand.hbm [shape: f32[1,128], index: 7, kind: output, shape index: {}]  }
   0x1   :  { %v12_v0 = vstv %s612_s6 }
   0x2   :  { %13 = vst [vmem:[#allocation2] sm:$0x1] %v12_v0 }
   0x3   :  { %14 = vsyncpa [#allocation4], 0 }
   0x4   :  { %15 = vsyncpa [#allocation7], 0 }
   0x5   :  { %16 = vsyncpa [#allocation5], 0  ;;  %s23_s28 = sshll.u32 %s607_s1, 4  ;;  %s474_s29 = smov [#allocation3]   ;;  %s24_s28 = int_to_ptr.hbm [resolvable:$true] %s23_s28 }
   0x6   :  { %s25_s30 = sshll.u32 %s474_s29, 4  ;;  %s38_s10 = sshll.u32 %s609_s3, 4  ;;  %s26_s30 = int_to_ptr.vmem [resolvable:$true] %s25_s30  ;;  %s39_s10 = int_to_ptr.hbm [resolvable:$true] %s38_s10 }
   0x7   :  { %s475_s11 = smov 128   ;;  %s476_s12 = smov 8  }
   0x8   :  { %31 = dma.hbm_to_vmem [thread:$0]  %s24_s28, 1024, %s26_s30, [#allocation4], %s475_s11, %s475_s11, %s476_s12  }
   0x9   :  { %s477_s6 = smov [#allocation6]  }
   0xa   :  { %s40_s13 = sshll.u32 %s477_s6, 4  ;;  %s41_s13 = int_to_ptr.vmem [resolvable:$true] %s40_s13 }
   0xb   :  { %46 = dma.hbm_to_vmem [thread:$0]  %s39_s10, 512, %s41_s13, [#allocation7], %s475_s11, %s475_s11, %s476_s12  }
   0xc   :  { %468 = dma.done.wait [#allocation4], 1024  }
   0xd   :  { %469 = vsyncadd [#allocation4], 4294966272 }
   0xe   :  { %470 = dma.done.wait [#allocation7], 512  }
   0xf   :  { %471 = vsyncadd [#allocation7], 4294966784  ;;  %v478_v1 = vmov 0   ;;  %vm151_vm0 = vcmask 1040384   ;;  %v69_v2 = vld [vmem:[%s606_s0 + $0x40] sm:$0x1] }
  0x10   :  { %389 = vset.pattern.permute.xlu0 %v478_v1  ;;  %390 = vset.pattern.permute.xlu1 %v478_v1  ;;  %v68_v3 = vld [vmem:[%s606_s0 + $0x38] sm:$0xff]  ;;  %v67_v4 = vld [vmem:[%s606_s0 + $0x30] sm:$0xff]  ;;  %v66_v6 = vld [vmem:[%s606_s0 + $0x28] sm:$0xff]  ;;  %vm126_vm1 = vcmask 531456   ;;  %vm232_vm2 = vcmask 523264   ;;  %vm286_vm3 = vcmask 261120  }
  0x11   :  { %391 = vset.pattern.permute.xlu2 %v478_v1  ;;  %366 = vmatpush.msk.msra.mxu3 %vm151_vm0, %v69_v2  ;;  %v85_v5 = vld [vmem:[%s608_s2 + $0x38] sm:$0xff]  ;;  %v83_v7 = vld [vmem:[%s608_s2 + $0x28] sm:$0xff]  ;;  %v65_v8 = vld [vmem:[%s606_s0 + $0x20] sm:$0xff]  ;;  %s339_s30 = sshll.u32 %s613_s7, 4  ;;  %s340_s30 = int_to_ptr.hbm [resolvable:$true] %s339_s30 }
  0x12   :  { %350 = vmatpush.msk.msra.mxu0 %vm151_vm0, %v69_v2  ;;  %365 = vmatpush.msk.msra.mxu2 %vm151_vm0, %v69_v2  ;;  %v64_v9 = vld [vmem:[%s606_s0 + $0x18] sm:$0xff]  ;;  %v84_v10 = vld [vmem:[%s608_s2 + $0x30] sm:$0xff]  ;;  %v82_v12 = vld [vmem:[%s608_s2 + $0x20] sm:$0xff] }
  0x13   :  { %368 = vmatpush.msra.mxu3 %v68_v3  ;;  %123 = vperm.xlu0 %389, %v85_v5   ;;  %v63_v11 = vld [vmem:[%s606_s0 + $0x10] sm:$0xff]  ;;  %v62_v13 = vld [vmem:[%s606_s0 + $0x8] sm:$0xff]  ;;  %v81_v14 = vld [vmem:[%s608_s2 + $0x18] sm:$0xff] }
  0x14   :  { %163 = vmatpush.msra.mxu0 %v68_v3  ;;  %367 = vmatpush.msra.mxu2 %v68_v3  ;;  %v61_v15 = vld [vmem:[%s606_s0] sm:$0xff]  ;;  %v79_v18 = vld [vmem:[%s608_s2 + $0x8] sm:$0xff]  ;;  %v80_v21 = vld [vmem:[%s608_s2 + $0x10] sm:$0xff] }
  0x15   :  { %370 = vmatpush.msra.mxu3 %v67_v4  ;;  %113 = vperm.xlu1 %390, %v83_v7   ;;  %v74_v16 = vld [vmem:[#allocation3 + $0x20] sm:$0xff]  ;;  %v73_v19 = vld [vmem:[#allocation3 + $0x18] sm:$0xff]  ;;  %v75_v22 = vld [vmem:[#allocation3 + $0x28] sm:$0xff] }
  0x16   :  { %164 = vmatpush.msra.mxu0 %v67_v4  ;;  %369 = vmatpush.msra.mxu2 %v67_v4  ;;  %v70_v17 = vld [vmem:[#allocation3] sm:$0xff]  ;;  %v71_v23 = vld [vmem:[#allocation3 + $0x8] sm:$0xff]  ;;  %v211_v26 = vld [vmem:[%s610_s4 + $0x18] sm:$0xff] }
  0x17   :  { %372 = vmatpush.msra.mxu3 %v66_v6  ;;  %103 = vperm.xlu2 %391, %v81_v14   ;;  %v78_v20 = vld [vmem:[%s608_s2] sm:$0xff]  ;;  %v210_v24 = vld [vmem:[%s610_s4 + $0x10] sm:$0xff]  ;;  %v209_v25 = vld [vmem:[%s610_s4 + $0x8] sm:$0xff] }
  0x18   :  { %165 = vmatpush.msra.mxu0 %v66_v6  ;;  %371 = vmatpush.msra.mxu2 %v66_v6  ;;  %v76_v27 = vld [vmem:[#allocation3 + $0x30] sm:$0xff]  ;;  %v279_v29 = vld [vmem:[#allocation2] sm:$0x1]  ;;  %v204_v0 = vld [vmem:[#allocation6] sm:$0xff] }
  0x19   :  { %374 = vmatpush.msra.mxu3 %v65_v8  ;;  %v72_v28 = vld [vmem:[#allocation3 + $0x10] sm:$0xff]  ;;  %v208_v30 = vld [vmem:[%s610_s4] sm:$0xff]  ;;  %v205_v1 = vld [vmem:[#allocation6 + $0x8] sm:$0xff] }
  0x1a   :  { %166 = vmatpush.msra.mxu0 %v65_v8  ;;  %373 = vmatpush.msra.mxu2 %v65_v8  ;;  %v77_v31 = vld [vmem:[#allocation3 + $0x38] sm:$0xff]  ;;  %v206_v2 = vld [vmem:[#allocation6 + $0x10] sm:$0xff] }
  0x1b   :  { %376 = vmatpush.msra.mxu3 %v64_v9  ;;  %118 = vperm.xlu0 %389, %v84_v10   ;;  %v207_v3 = vld [vmem:[#allocation6 + $0x18] sm:$0xff] }
  0x1c   :  { %167 = vmatpush.msra.mxu0 %v64_v9  ;;  %375 = vmatpush.msra.mxu2 %v64_v9 }
  0x1d   :  { %378 = vmatpush.msra.mxu3 %v63_v11  ;;  %108 = vperm.xlu1 %390, %v82_v12  }
  0x1e   :  { %168 = vmatpush.msra.mxu0 %v63_v11  ;;  %377 = vmatpush.msra.mxu2 %v63_v11 }
  0x1f   :  { %380 = vmatpush.msra.mxu3 %v62_v13  ;;  %98 = vperm.xlu2 %391, %v80_v21  }
  0x20   :  { %169 = vmatpush.msra.mxu0 %v62_v13  ;;  %379 = vmatpush.msra.mxu2 %v62_v13 }
  0x21   :  { %382 = vmatpush.msra.mxu3 %v61_v15 }
  0x22   :  { %170 = vmatpush.msra.mxu0 %v61_v15  ;;  %355 = vmatmul.msk.f32.vlgmr.msra.gmra.mxu3 %vm126_vm1, %v74_v16 }
  0x23   :  { %351 = vmatmul.msk.f32.vlgmr.msra.gmra.mxu0 %vm126_vm1, %v70_v17  ;;  %381 = vmatpush.msra.mxu2 %v61_v15 }
  0x24   :  { %93 = vperm.xlu0 %389, %v79_v18   ;;  %354 = vmatmul.msk.f32.vlgmr.msra.gmra.mxu2 %vm126_vm1, %v73_v19 }
  0x25   :  { %88 = vperm.xlu1 %390, %v78_v20   ;;  %v278_v20 = vld [vmem:[%s611_s5] sm:$0x1]  ;;  %s479_s5 = smov [#allocation8]  }
  0x26   :  { %s337_s27 = sshll.u32 %s479_s5, 4  ;;  %s338_s27 = int_to_ptr.vmem [resolvable:$true] %s337_s27 }
  0x27   :  { %229 = vperm.xlu2 %391, %v211_v26  }
  0x2a   :  { %356 = vmatmul.msk.f32.gmra.mxu3 %vm126_vm1, %v75_v22 }
  0x2b   :  { %352 = vmatmul.msk.f32.gmra.mxu0 %vm126_vm1, %v71_v23 }
  0x2c   :  { %224 = vperm.xlu0 %389, %v210_v24  }
  0x2d   :  { %219 = vperm.xlu1 %390, %v209_v25  }
  0x2f   :  { %214 = vperm.xlu2 %391, %v208_v30  }
  0x32   :  { %357 = vmatmul.msk.f32.gmra.mxu3 %vm126_vm1, %v76_v27 }
  0x33   :  { %353 = vmatmul.msk.f32.gmra.mxu0 %vm126_vm1, %v72_v28 }
  0x34   :  { %282 = vperm.xlu0 %389, %v279_v29  }
  0x3a   :  { %358 = vmatmul.msk.f32.gmra.mxu3 %vm126_vm1, %v77_v31 }
  0x71   :  { %v104_v39 = vpop.permute.xlu2 %103 }
  0x79   :  { %v99_v53 = vpop.permute.xlu2 %98 }
  0x81   :  { %v230_v7 = vpop.permute.xlu2 %229 }
  0x85   :  { %v124_v35 = vpop.permute.xlu0 %123 }
  0x87   :  { %v114_v36 = vpop.permute.xlu1 %113 }
  0x89   :  { %v215_v15 = vpop.permute.xlu2 %214 }
  0x8d   :  { %v119_v40 = vpop.permute.xlu0 %118 }
  0x8f   :  { %v109_v44 = vpop.permute.xlu1 %108 }
  0x96   :  { %v94_v56 = vpop.permute.xlu0 %93 }
  0x97   :  { %v89_v59 = vpop.permute.xlu1 %88 }
  0x9e   :  { %v225_v8 = vpop.permute.xlu0 %224 }
  0x9f   :  { %v220_v12 = vpop.permute.xlu1 %219 }
  0xa0   :  { %v172_v34 = vpop.f32.mrf.mxu0 }
  0xa1   :  { %v173_v60 = vadd.f32 %v172_v34, %v89_v59 }
  0xa3   :  { %v196_v63 = vmax.f32 %v173_v60, 0.0 }
  0xa5   :  { %v184_v32 = vpop.f32.mrf.mxu3 }
  0xa6   :  { %v185_v48 = vadd.f32 %v184_v32, %v109_v44  ;;  %v283_v21 = vpop.permute.xlu0 %282 }
  0xa7   :  { %v181_v47 = vpop.f32.mrf.mxu2  ;;  %v285_v22 = vperm.slane %v283_v21, 0 }
  0xa8   :  { %v175_v38 = vpop.f32.mrf.mxu0  ;;  %v182_v52 = vadd.f32 %v181_v47, %v104_v39  ;;  %v200_v54 = vmax.f32 %v185_v48, 0.0 }
  0xa9   :  { %v176_v57 = vadd.f32 %v175_v38, %v94_v56 }
  0xaa   :  { %v199_v58 = vmax.f32 %v182_v52, 0.0 }
  0xab   :  { %v197_v62 = vmax.f32 %v176_v57, 0.0 }
  0xad   :  { %v187_v33 = vpop.f32.mrf.mxu3 }
  0xae   :  { %v188_v45 = vadd.f32 %v187_v33, %v114_v36 }
  0xb0   :  { %v178_v50 = vpop.f32.mrf.mxu0  ;;  %v201_v51 = vmax.f32 %v188_v45, 0.0 }
  0xb1   :  { %v179_v55 = vadd.f32 %v178_v50, %v99_v53 }
  0xb3   :  { %v198_v61 = vmax.f32 %v179_v55, 0.0 }
  0xb5   :  { %v190_v37 = vpop.f32.mrf.mxu3 }
  0xb6   :  { %v191_v42 = vadd.f32 %v190_v37, %v119_v40 }
  0xb8   :  { %v202_v49 = vmax.f32 %v191_v42, 0.0 }
  0xbd   :  { %v193_v41 = vpop.f32.mrf.mxu3 }
  0xbe   :  { %v194_v43 = vadd.f32 %v193_v41, %v124_v35 }
  0xc0   :  { %v203_v46 = vmax.f32 %v194_v43, 0.0 }
  0xc2   :  { %253 = vmatpush.msra.mxu1 %v203_v46 }
  0xc4   :  { %254 = vmatpush.msra.mxu1 %v202_v49 }
  0xc6   :  { %255 = vmatpush.msra.mxu1 %v201_v51 }
  0xc8   :  { %256 = vmatpush.msra.mxu1 %v200_v54 }
  0xca   :  { %257 = vmatpush.msra.mxu1 %v199_v58 }
  0xcc   :  { %258 = vmatpush.msra.mxu1 %v198_v61 }
  0xce   :  { %259 = vmatpush.msra.mxu1 %v197_v62 }
  0xd0   :  { %260 = vmatpush.msra.mxu1 %v196_v63 }
  0xd1   :  { %359 = vmatmul.msk.f32.vlgmr.msra.gmra.mxu1 %vm232_vm2, %v204_v0 }
  0xd9   :  { %360 = vmatmul.msk.f32.gmra.mxu1 %vm232_vm2, %v205_v1 }
  0xe1   :  { %361 = vmatmul.msk.f32.gmra.mxu1 %vm232_vm2, %v206_v2 }
  0xe9   :  { %362 = vmatmul.msk.f32.gmra.mxu1 %vm232_vm2, %v207_v3 }
 0x14e   :  { %v262_v4 = vpop.f32.mrf.mxu1 }
 0x14f   :  { %v263_v16 = vadd.f32 %v262_v4, %v215_v15 }
 0x151   :  { %v274_v19 = vmax.f32 %v263_v16, 0.0 }
 0x156   :  { %v265_v5 = vpop.f32.mrf.mxu1 }
 0x157   :  { %v266_v13 = vadd.f32 %v265_v5, %v220_v12 }
 0x159   :  { %v275_v18 = vmax.f32 %v266_v13, 0.0 }
 0x15e   :  { %v268_v6 = vpop.f32.mrf.mxu1 }
 0x15f   :  { %v269_v10 = vadd.f32 %v268_v6, %v225_v8 }
 0x161   :  { %v276_v17 = vmax.f32 %v269_v10, 0.0 }
 0x166   :  { %v271_v9 = vpop.f32.mrf.mxu1 }
 0x167   :  { %v272_v11 = vadd.f32 %v271_v9, %v230_v7 }
 0x169   :  { %v277_v14 = vmax.f32 %v272_v11, 0.0 }
 0x16b   :  { %302 = vmatpush.msrb.mxu2 %v277_v14 }
 0x16d   :  { %303 = vmatpush.msrb.mxu2 %v276_v17 }
 0x16f   :  { %304 = vmatpush.msrb.mxu2 %v275_v18 }
 0x171   :  { %305 = vmatpush.msrb.mxu2 %v274_v19 }
 0x172   :  { %363 = vmatmul.msk.f32.vlgmr.msrb.gmra.mxu2 %vm286_vm3, %v278_v20 }
 0x1f5   :  { %v307_v23 = vpop.f32.mrf.mxu2 }
 0x1f6   :  { %v308_v24 = vadd.f32 %v307_v23, %v285_v22 }
 0x1f8   :  { %v364_v25 = vmul.f32 -1.442695, %v308_v24 }
 0x1fa   :  { %392 = vpow2.f32 %v364_v25 }
 0x200   :  { %v393_v26 = vpop.eup %392 }
 0x201   :  { %v313_v27 = vadd.f32 1.0, %v393_v26 }
 0x203   :  { %394 = vrcp.f32 %v313_v27  ;;  %v325_v31 = vand.u32 2147483648, %v313_v27  ;;  %v323_v33 = vand.u32 2147483647, %v313_v27  ;;  %vm319_vm5 = vweird.f32 %v313_v27 }
 0x205   :  { %v326_v35 = vor.u32 1.1754944e-38, %v325_v31  ;;  %vm324_vm7 = vcmp.eq.f32.partialorder %v323_v33, 8.507059e+37 }
 0x209   :  { %v395_v28 = vpop.eup %394 }
 0x20a   :  { %v315_v29 = vmul.f32 %v395_v28, %v313_v27  ;;  %vm320_vm4 = vweird.f32 %v395_v28 }
 0x20b   :  { %vm321_vm6 = vmor %vm319_vm5, %vm320_vm4 }
 0x20c   :  { %v316_v30 = vsub.f32 1.0, %v315_v29 }
 0x20e   :  { %v317_v32 = vmul.f32 %v395_v28, %v316_v30 }
 0x210   :  { %v318_v34 = vadd.f32 %v395_v28, %v317_v32 }
 0x212   :  { %v322_v36 = vsel %vm321_vm6, %v395_v28, %v318_v34 }
 0x213   :  { %v327_v37 = vsel %vm324_vm7, %v326_v35, %v322_v36 }
 0x214   :  { %v329_v38 = vmul.f32 4.0, %v327_v37 }
 0x216   :  { %v330_v39 = vadd.f32 1.0, %v329_v38 }
 0x218   :  { %331 = vst [vmem:[#allocation8] sm:$0x1] %v330_v39 }
 0x219   :  { %342 = dma.vmem_to_hbm [thread:$0]  %s338_s27, 16, %s340_s30, [#allocation5]  }
 0x21a   :  { %472 = dma.done.wait [#allocation5], 16  }
 0x21b   :  { %473 = vsyncadd [#allocation5], 4294967280 }
 0x21c   :  { %347 = vsyncpa [#allocation4], 1 }
 0x21d   :  { %348 = vsyncpa [#allocation7], 1 }
 0x21e   :  { %349 = vsyncpa [#allocation5], 1 }

</bundles_post_ra>
